<compile_context>
chip_gen: v5e
topology: v5e:2x2
jax: 0.10.0
libtpu: 0.0.40
codegen_flags: <defaults>
</compile_context>

<pallas_src>
import functools

import jax
import jax.numpy as jnp
import numpy as np
from jax.experimental import pallas as pl
from jax.experimental.pallas import tpu as pltpu

_LANES = 128
_SUBLANES = 8
_VMEM_LIMIT_BYTES = 48 << 20      # fits v7x (64 MiB physical) with headroom; << v5e/v6e 128 MiB
_TILE_BYTES = 4 << 20             # per logits VMEM buffer; x2 double-buffer + f32 temps << limit


def _round_up(x, m):
    return ((x + m - 1) // m) * m


def _focal_loss_kernel(logits_ref, tgt_ref, wt_ref, out_ref, *, gamma, n_rows, tile_n):
    x = logits_ref[...].astype(jnp.float32)     # (TILE_N, C) — full class width, no lane padding
    t = tgt_ref[...]                            # (TILE_N, 1) int32
    wt = wt_ref[...].astype(jnp.float32)        # (TILE_N, 1)

    # Row validity for the (possibly ragged) last tile — padding is done here, not in XLA.
    row = pl.program_id(0) * tile_n + jax.lax.broadcasted_iota(jnp.int32, (tile_n, 1), 0)
    valid = row < n_rows                        # (TILE_N, 1) bool

    # Numerically-stable log-softmax pieces (per-row, so garbage rows can't leak across rows).
    m = jnp.max(x, axis=-1, keepdims=True)                          # (TILE_N, 1)
    z = x - m
    lse = jnp.log(jnp.sum(jnp.exp(z), axis=-1, keepdims=True))      # (TILE_N, 1)

    # Target logit via (iota == target) select + lane reduction.
    col = jax.lax.broadcasted_iota(jnp.int32, x.shape, 1)
    z_t = jnp.sum(jnp.where(col == t, z, 0.0), axis=-1, keepdims=True)

    # Per-sample weighted CE; matches F.cross_entropy(..., reduction='none', weight=w).
    ce = wt * (lse - z_t)                                           # (TILE_N, 1)

    # Focal modulation: (1 - pt)^gamma * ce with pt = exp(-ce).
    pt = jnp.exp(-ce)
    one_minus_pt = jnp.maximum(1.0 - pt, 0.0)   # clamp rounding noise (pt can hit 1+eps)

    g_int = int(gamma)
    if float(gamma) == float(g_int) and 0 <= g_int <= 8:
        # Integer gamma: repeated multiply on the VPU instead of pow (log+exp on the single EUP).
        mod = jnp.ones_like(one_minus_pt) if g_int == 0 else one_minus_pt
        for _ in range(g_int - 1):
            mod = mod * one_minus_pt
    else:
        mod = jnp.power(one_minus_pt, gamma)

    # jnp.where (select), NOT a 0-multiply: out-of-range rows may hold inf/NaN garbage.
    focal = jnp.where(valid, mod * ce, 0.0)
    total = jnp.sum(focal)                      # per-tile partial sum (scalar)
    out_ref[...] = jnp.broadcast_to(total, out_ref.shape).astype(out_ref.dtype)


def focal_loss(logits, targets, *, gamma=2.0, weight=None, reduction="mean"):
    """Pallas FocalLoss forward. logits: (N, C) float; targets: (N,) int."""
    n, c = logits.shape
    targets = targets.astype(jnp.int32)

    # Per-sample class-weight gather stays in the wrapper: only N elements of traffic,
    # and it keeps the gather off the kernel's critical path.
    if weight is None:
        w_t = jnp.ones((n,), jnp.float32)
    else:
        w_t = weight.astype(jnp.float32)[targets]

    itemsize = jnp.dtype(logits.dtype).itemsize
    c_lane = _round_up(c, _LANES)               # VMEM layout width per row
    bytes_per_row = c_lane * itemsize
    # Native sublane packing: (8,128) for 32-bit, (16,128) for 16-bit, (32,128) for 8-bit.
    row_align = _SUBLANES * max(1, 4 // itemsize)

    # Size the tile by bytes (amortizes the ~0.35us per-grid-step overhead), then clamp to N.
    tile_n = max(row_align, (_TILE_BYTES // bytes_per_row) // row_align * row_align)
    tile_n = min(tile_n, _round_up(n, row_align))
    num_tiles = pl.cdiv(n, tile_n)
    # Make sure the grid can span both TensorCores on v7x whenever there is enough work.
    if num_tiles == 1 and n > row_align:
        tile_n = _round_up(pl.cdiv(n, 2), row_align)
        num_tiles = pl.cdiv(n, tile_n)

    kernel = functools.partial(_focal_loss_kernel, gamma=float(gamma),
                               n_rows=n, tile_n=tile_n)

    partials = pl.pallas_call(
        kernel,
        out_shape=jax.ShapeDtypeStruct((num_tiles, _SUBLANES, _LANES), jnp.float32),
        grid=(num_tiles,),
        in_specs=[
            pl.BlockSpec((tile_n, c), lambda i: (i, 0)),   # logits tile, full C width (no pad)
            pl.BlockSpec((tile_n, 1), lambda i: (i, 0)),   # targets tile
            pl.BlockSpec((tile_n, 1), lambda i: (i, 0)),   # per-sample weights
        ],
        out_specs=pl.BlockSpec((1, _SUBLANES, _LANES), lambda i: (i, 0, 0)),
        compiler_params=pltpu.CompilerParams(
            dimension_semantics=("parallel",),
            vmem_limit_bytes=_VMEM_LIMIT_BYTES,
        ),
    )(logits, targets.reshape(n, 1), w_t.reshape(n, 1))

    total = jnp.sum(partials[:, 0, 0])
    if reduction == "mean":
        return total / jnp.float32(n)
    return total


def _focal_loss_ref(logits, targets, *, gamma=2.0, weight=None, reduction="mean"):
    # Pure-JAX reference mirroring torch cross_entropy(reduction='none') + focal term.
    logz = jax.nn.log_softmax(logits.astype(jnp.float32), axis=-1)
    nll = -jnp.take_along_axis(logz, targets[:, None].astype(jnp.int32), axis=-1)[:, 0]
    if weight is not None:
        nll = nll * weight[targets]
    pt = jnp.exp(-nll)
    focal = (1.0 - pt) ** gamma * nll
    return jnp.mean(focal) if reduction == "mean" else jnp.sum(focal)


if __name__ == "__main__":
    key = jax.random.PRNGKey(0)
    k1, k2, k3 = jax.random.split(key, 3)

    N, C = 16, 8  # small: 16 samples, 8 classes
    logits = jax.random.normal(k1, (N, C), dtype=jnp.float32) * 2.0
    targets = jax.random.randint(k2, (N,), 0, C, dtype=jnp.int32)

    # FocalLoss() defaults: weight=None, gamma=2.0, reduction='mean'
    loss = focal_loss(logits, targets, gamma=2.0, weight=None, reduction="mean")
    loss = jax.block_until_ready(loss)
    ref = _focal_loss_ref(logits, targets, gamma=2.0, weight=None, reduction="mean")
    np.testing.assert_allclose(np.asarray(loss), np.asarray(ref), rtol=1e-5, atol=1e-6)

    # Weighted + sum-reduction path (mirrors the reference: weight inside pt, mean over N).
    class_w = jax.random.uniform(k3, (C,), dtype=jnp.float32) + 0.5
    loss_w = focal_loss(logits, targets, gamma=2.0, weight=class_w, reduction="sum")
    loss_w = jax.block_until_ready(loss_w)
    ref_w = _focal_loss_ref(logits, targets, gamma=2.0, weight=class_w, reduction="sum")
    np.testing.assert_allclose(np.asarray(loss_w), np.asarray(ref_w), rtol=1e-5, atol=1e-6)

    # Ragged-N path (N not a multiple of the tile/sublane size) exercises in-kernel masking.
    N2 = 13
    logits2 = jax.random.normal(k1, (N2, C), dtype=jnp.float32) * 2.0
    targets2 = jax.random.randint(k2, (N2,), 0, C, dtype=jnp.int32)
    loss2 = jax.block_until_ready(focal_loss(logits2, targets2))
    ref2 = _focal_loss_ref(logits2, targets2)
    np.testing.assert_allclose(np.asarray(loss2), np.asarray(ref2), rtol=1e-5, atol=1e-6)

    print("KERNEL_OK")
</pallas_src>

<mosaic_0001>
module attributes {stable_mosaic.version = 11 : i64} {
  func.func @_focal_loss_kernel(%arg0: i32, %arg1: memref<8x8xf32, #tpu.memory_space<vmem>>, %arg2: memref<8x1xi32, #tpu.memory_space<vmem>>, %arg3: memref<8x1xf32, #tpu.memory_space<vmem>>, %arg4: memref<1x8x128xf32, #tpu.memory_space<vmem>>) attributes {dimension_semantics = [#tpu.dimension_semantics<parallel>], iteration_bounds = array<i64: 2>, scalar_prefetch = 0 : i64, scratch_operands = 0 : i64, tpu.core_type = #tpu.core_type<tc>, window_params = [{transform_indices = @transform_0, window_bounds = array<i64: 8, 8>}, {transform_indices = @transform_1, window_bounds = array<i64: 8, 1>}, {transform_indices = @transform_2, window_bounds = array<i64: 8, 1>}, {transform_indices = @transform_3, window_bounds = array<i64: 1, 8, 128>}]} {
    %c0 = arith.constant 0 : index
    %c0_0 = arith.constant 0 : index
    %0 = vector.load %arg1[%c0, %c0_0] : memref<8x8xf32, #tpu.memory_space<vmem>>, vector<8x8xf32>
    %c0_1 = arith.constant 0 : index
    %c0_2 = arith.constant 0 : index
    %1 = vector.load %arg2[%c0_1, %c0_2] : memref<8x1xi32, #tpu.memory_space<vmem>>, vector<8x1xi32>
    %c0_3 = arith.constant 0 : index
    %c0_4 = arith.constant 0 : index
    %2 = vector.load %arg3[%c0_3, %c0_4] : memref<8x1xf32, #tpu.memory_space<vmem>>, vector<8x1xf32>
    %c8_i32 = arith.constant 8 : i32
    %3 = arith.muli %arg0, %c8_i32 : i32
    %4 = tpu.iota {dimensions = array<i32: 0>} : vector<8x1xi32>
    %5 = vector.broadcast %3 : i32 to vector<8x1xi32>
    %6 = arith.addi %5, %4 : vector<8x1xi32>
    %c16_i32 = arith.constant 16 : i32
    %7 = vector.broadcast %c16_i32 : i32 to vector<8x1xi32>
    %8 = arith.cmpi slt, %6, %7 : vector<8x1xi32>
    %cst = arith.constant dense<0xFF800000> : vector<8xf32>
    %9 = vector.multi_reduction <maximumf>, %0, %cst [1] : vector<8x8xf32> to vector<8xf32>
    %10 = vector.shape_cast %9 : vector<8xf32> to vector<8x1xf32>
    %11 = vector.broadcast %10 : vector<8x1xf32> to vector<8x8xf32>
    %12 = arith.subf %0, %11 : vector<8x8xf32>
    %13 = math.exp %12 : vector<8x8xf32>
    %cst_5 = arith.constant dense<0.000000e+00> : vector<8xf32>
    %14 = vector.multi_reduction <add>, %13, %cst_5 [1] : vector<8x8xf32> to vector<8xf32>
    %15 = vector.shape_cast %14 : vector<8xf32> to vector<8x1xf32>
    %16 = math.log %15 : vector<8x1xf32>
    %17 = tpu.iota {dimensions = array<i32: 1>} : vector<8x8xi32>
    %18 = vector.broadcast %1 : vector<8x1xi32> to vector<8x8xi32>
    %19 = arith.cmpi eq, %17, %18 : vector<8x8xi32>
    %cst_6 = arith.constant 0.000000e+00 : f32
    %20 = vector.broadcast %cst_6 : f32 to vector<8x8xf32>
    %21 = arith.select %19, %12, %20 : vector<8x8xi1>, vector<8x8xf32>
    %cst_7 = arith.constant dense<0.000000e+00> : vector<8xf32>
    %22 = vector.multi_reduction <add>, %21, %cst_7 [1] : vector<8x8xf32> to vector<8xf32>
    %23 = vector.shape_cast %22 : vector<8xf32> to vector<8x1xf32>
    %24 = arith.subf %16, %23 : vector<8x1xf32>
    %25 = arith.mulf %2, %24 : vector<8x1xf32>
    %cst_8 = arith.constant 0.000000e+00 : f32
    %26 = vector.broadcast %cst_8 : f32 to vector<8x1xf32>
    %27 = arith.subf %26, %25 : vector<8x1xf32>
    %28 = math.exp %27 : vector<8x1xf32>
    %cst_9 = arith.constant 1.000000e+00 : f32
    %29 = vector.broadcast %cst_9 : f32 to vector<8x1xf32>
    %30 = arith.subf %29, %28 : vector<8x1xf32>
    %cst_10 = arith.constant 0.000000e+00 : f32
    %31 = vector.broadcast %cst_10 : f32 to vector<8x1xf32>
    %32 = arith.maximumf %30, %31 : vector<8x1xf32>
    %33 = arith.mulf %32, %32 : vector<8x1xf32>
    %34 = arith.mulf %33, %25 : vector<8x1xf32>
    %cst_11 = arith.constant 0.000000e+00 : f32
    %35 = vector.broadcast %cst_11 : f32 to vector<8x1xf32>
    %36 = arith.select %8, %34, %35 : vector<8x1xi1>, vector<8x1xf32>
    %37 = vector.shape_cast %36 : vector<8x1xf32> to vector<1x8x1xf32>
    %cst_12 = arith.constant dense<0.000000e+00> : vector<1xf32>
    %38 = vector.multi_reduction <add>, %37, %cst_12 [1, 2] : vector<1x8x1xf32> to vector<1xf32>
    %39 = vector.shape_cast %38 : vector<1xf32> to vector<1x1x1xf32>
    %40 = vector.extract %39[0, 0, 0] : f32 from vector<1x1x1xf32>
    %41 = vector.broadcast %40 : f32 to vector<1x8x128xf32>
    %c0_13 = arith.constant 0 : index
    %c0_14 = arith.constant 0 : index
    %c0_15 = arith.constant 0 : index
    %42 = vector.load %arg4[%c0_13, %c0_14, %c0_15] : memref<1x8x128xf32, #tpu.memory_space<vmem>>, vector<1x8x128xf32>
    tpu.vector_store %arg4[%c0_13, %c0_14, %c0_15], %41 {strides = array<i32>} : memref<1x8x128xf32, #tpu.memory_space<vmem>>, vector<1x8x128xf32>,
    return
  }
  func.func @transform_0(%arg0: i32) -> (i32, i32) {
    %c0_i32 = arith.constant 0 : i32
    %c0_i32_0 = arith.constant 0 : i32
    return %arg0, %c0_i32 : i32, i32
  }
  func.func @transform_1(%arg0: i32) -> (i32, i32) {
    %c0_i32 = arith.constant 0 : i32
    %c0_i32_0 = arith.constant 0 : i32
    return %arg0, %c0_i32 : i32, i32
  }
  func.func @transform_2(%arg0: i32) -> (i32, i32) {
    %c0_i32 = arith.constant 0 : i32
    %c0_i32_0 = arith.constant 0 : i32
    return %arg0, %c0_i32 : i32, i32
  }
  func.func @transform_3(%arg0: i32) -> (i32, i32, i32) {
    %c0_i32 = arith.constant 0 : i32
    %c0_i32_0 = arith.constant 0 : i32
    %c0_i32_1 = arith.constant 0 : i32
    return %arg0, %c0_i32, %c0_i32_0 : i32, i32, i32
  }
}

</mosaic_0001>

<bundles_post_ra>
// kernel: tpu_custom_call.1
= control target key start
LH: loop header
LB: loop body
LE: loop exit
PB: predicated region body
PF: predicated region fallthrough
CT: control target
= control target key end

     0   :  { %8 = vsyncpa [#allocation3], 0  ;;  %s594_s0 = inlined_call_operand.vmem [shape: f32[16,8], index: 0, kind: input, shape index: {}]   ;;  %s595_s1 = inlined_call_operand.vmem [shape: s32[16,1], index: 1, kind: input, shape index: {}]   ;;  %s596_s2 = inlined_call_operand.vmem [shape: f32[16,1], index: 2, kind: input, shape index: {}]   ;;  %s597_s3 = inlined_call_operand.hbm [shape: f32[2,8,128], index: 3, kind: output, shape index: {}]  }
   0x1   :  { %10 = vsyncpa [#allocation3 + $0x1], 0  ;;  %s500_s12 = smov 0   ;;  %s502_s13 = smov 0  }
   0x2   :  { %s504_s14 = smov 0   ;;  %s506_s15 = smov 0  }
   0x3 LB: > { %s521_s16 = sadd.s32 4294967295, %s477_s15   ;;  %s353_s17 = sadd.s32 4294967294, %s477_s15   ;;  %s477_s15 = sphi %s506_s15, %s603_s15   ;;  %s473_s14 = sphi %s504_s14, %s602_s14   ;;  %s469_s13 = sphi %s502_s13, %s601_s13   ;;  %s465_s12 = sphi %s500_s12, %s600_s12  }
   0x4   : > { %s525_s18 = sadd.s32 1, %s477_s15   ;;  %s101_s19 = sadd.s32 1, %s473_s14 }
   0x5   : > { %s98_s20 = ssub.s32 %s477_s15, %s525_s18  ;;  %p111_p0 = scmp.ne.s32.totalorder %s473_s14, %s469_s13 }
   0x6   : > { %p99_p1 = scmp.eq.s32.totalorder %s98_s20, 0  ;;  %p112_p2 = scmp.eq.s32.totalorder %s521_s16, 1 }
   0x7   : > { %p117_p3 = scmp.ne.s32.totalorder %s469_s13, %s465_s12  ;;  %p118_p4 = scmp.eq.s32.totalorder %s353_s17, 1 }
   0x8   : > { %s536_s21 = scalar_select %p99_p1, %s473_s14, %s101_s19  }
   0x9   : > { %p538_p5 = por %p112_p2, %p111_p0  ;;  %p542_p6 = por %p118_p4, %p117_p3 }
   0xa   : > { %p356_p7 = scmp.ge.s32.totalorder %s477_s15, 1  ;;  %p157_p8 = scmp.lt.s32.totalorder %s477_s15, 3 }
   0xc   : > { %p158_p9 = pnand %p356_p7, %p157_p8 }
   0xd   : > { %p188_p10 = scmp.lt.s32.totalorder (!%p158_p9), %s521_s16, 1  ;;  %s361_s8 = sshll.u32 (!%p158_p9), %s521_s16, 3 }
   0xe   : > { %161 = sbr.rel (%p158_p9) target bundleno = 486 (0x1e6), region = 32  ;;  %s185_s9 = sand.u32 (!%p158_p9), 1, %s469_s13  }
   0xf   : > { %s357_s10 = sshll.u32 (!%p158_p9), %s185_s9, 3  ;;  %s265_s17 = scalar_lea.hbm (!%p158_p9), %s597_s3, %s361_s8 }
  0x10   : > { %s187_s19 = scalar_lea.vmem (!%p158_p9), [#allocation2], %s357_s10  ;;  %s255_s26 = scalar_lea.sflag (!%p158_p9), [#allocation3], %s185_s9 }
  0x11   : > { %s267_s20 = sshll.u32 (!%p158_p9), %s187_s19, 4  ;;  %s268_s20 = int_to_ptr.vmem [resolvable:$true] %s267_s20 }
  0x13   : > { %v479_v0 = vmov 0   ;;  %s189_s24 = scalar_select %p188_p10, %s521_s16, 1  ;;  %vm209_vm0 = vcmask 64512   ;;  %v204_v9 = vlaneseq  ;;  %v206_v24 = vstv %s361_s8 }
  0x14   : > { %408 = vset.pattern.permute.xlu0 %v479_v0  ;;  %vm241_vm3 = vcmask 7168  }
  0x15   : > { %s358_s25 = sshll.u32 %s189_s24, 3  ;;  %v222_v10 = vand.u32 127, %v204_v9  ;;  %v205_v23 = vshrl.u32 %v204_v9, 7  ;;  %s269_s24 = sshll.u32 %s265_s17, 4  ;;  %s270_s24 = int_to_ptr.hbm [resolvable:$true] %s269_s24 }
  0x16   : > { %s191_s28 = scalar_lea.vmem %s594_s0, %s358_s25  ;;  %s195_s4 = scalar_lea.vmem %s595_s1, %s358_s25 }
  0x17   : > { %v200_v1 = vld [vmem:[%s191_s28] sm:$0xff]  ;;  %s199_s7 = scalar_lea.vmem %s596_s2, %s358_s25  ;;  %v207_v27 = vadd.s32 %v206_v24, %v205_v23  ;;  %s429_s27 = sshra.s32 %s270_s24, 4  ;;  %s430_s27 = int_to_ptr.hbm [resolvable:$true] %s429_s27 }
  0x18   : > { %v210_v2 = vsel %vm209_vm0, %v200_v1, -inf  ;;  %v201_v3 = vld [vmem:[%s195_s4] sm:$0xff]  ;;  %s431_s28 = scalar_lea.hbm %s430_s27, 8  ;;  %s435_s4 = scalar_lea.hbm %s597_s3, 16 }
  0x19   : > { %211 = vmax.xlane.f32.xlu0 %v210_v2  ;;  %v202_v17 = vld [vmem:[%s199_s7] sm:$0xff]  ;;  %vm208_vm2 = vcmp.lt.s32.totalorder %v207_v27, 16  ;;  %p432_p11 = scmp.ne.s32.totalorder %s430_s27, %s431_s28  ;;  %p436_p0 = scmp.lt.s32.totalorder %s430_s27, %s597_s3 }
  0x1a   : > { %p437_p1 = scmp.lt.s32.totalorder %s435_s4, %s431_s28 }
  0x1b   : > { %p433_p12 = pnand %p432_p11, %p538_p5 }
  0x1c   : > { %p438_p2 = por %p437_p1, %p436_p0 }
  0x1d   : > { %p434_p13 = pneg %p433_p12 }
  0x1f   : > { %p439_p3 = pnand %p438_p2, %p434_p13 }
  0x2d   : > { %224 = vperm.xlu0 %408, %v201_v3  }
  0x8c   : > { %v212_v4 = vpop.xlane.xlu0 %211 }
  0x8d   : > { %v213_v5 = vsub.f32 %v200_v1, %v212_v4 }
  0x8f   : > { %v214_v6 = vmul.f32 1.442695, %v213_v5 }
  0x91   : > { %409 = vpow2.f32 %v214_v6 }
  0x97   : > { %v410_v7 = vpop.eup %409 }
  0x98   : > { %v216_v8 = vsel %vm209_vm0, %v410_v7, 0.0 }
  0x99   : > { %217 = vadd.xlane.f32.xlu1 %v216_v8 }
  0x9f   : > { %v225_v11 = vpop.permute.xlu0 %224 }
  0xa0   : > { %vm226_vm1 = vcmp.eq.s32.totalorder %v222_v10, %v225_v11 }
  0xa1   : > { %v227_v12 = vsel %vm226_vm1, %v213_v5, 0.0 }
  0xa2   : > { %v228_v13 = vsel %vm209_vm0, %v227_v12, 0.0 }
  0xa3   : > { %229 = vadd.xlane.f32.xlu1 %v228_v13 }
 0x10c   : > { %v218_v14 = vpop.xlane.xlu1 %217 }
 0x10d   : > { %411 = vlog2.f32 %v218_v14 }
 0x113   : > { %v412_v15 = vpop.eup %411 }
 0x114   : > { %v220_v16 = vmul.f32 0.6931472, %v412_v15 }
 0x116   : > { %v230_v18 = vpop.xlane.xlu1 %229 }
 0x117   : > { %v231_v19 = vsub.f32 %v220_v16, %v230_v18 }
 0x119   : > { %v232_v20 = vmul.f32 %v231_v19, %v202_v17 }
 0x11b   : > { %v233_v21 = vsub.f32 0.0, %v232_v20 }
 0x11d   : > { %v234_v22 = vmul.f32 1.442695, %v233_v21 }
 0x11f   : > { %413 = vpow2.f32 %v234_v22 }
 0x125   : > { %v414_v25 = vpop.eup %413 }
 0x126   : > { %v236_v26 = vsub.f32 1.0, %v414_v25 }
 0x128   : > { %v237_v28 = vmax.f32 %v236_v26, 0.0 }
 0x12a   : > { %v238_v29 = vmul.f32 %v237_v28, %v237_v28 }
 0x12c   : > { %v239_v30 = vmul.f32 %v238_v29, %v232_v20 }
 0x12e   : > { %v240_v31 = vsel %vm208_vm2, %v239_v30, 0.0 }
 0x12f   : > { %v242_v32 = vsel %vm241_vm3, %v240_v31, 0.0 }
 0x130   : > { %243 = vadd.xlane.f32.xlu2 %v242_v32 }
 0x1a3   : > { %v244_v33 = vpop.xlane.xlu2 %243 }
 0x1a4   : > { %v245_v34 = vrot.slane %v244_v33, 4 }
 0x1a6   : > { %v246_v35 = vadd.f32 %v245_v34, %v244_v33 }
 0x1a8   : > { %v247_v36 = vrot.slane %v246_v35, 2 }
 0x1aa   : > { %v248_v37 = vadd.f32 %v247_v36, %v246_v35 }
 0x1ac   : > { %v249_v38 = vrot.slane %v248_v37, 1 }
 0x1ae   : > { %v250_v39 = vadd.f32 %v249_v38, %v248_v37 }
 0x1b0   : > { %366 = vpush %v250_v39 }
 0x1e1   : > { %s367_s25 = spop %366 }
 0x1e2   : > { %v252_v40 = vstv %s367_s25 }
 0x1e3   : > { %253 = vst [vmem:[%s187_s19] sm:$0xff] %v252_v40 }
 0x1e4   : > { %442 = shalt.err (!%p439_p3)
}
 0x1e5   : > { %368 = dma.vmem_to_hbm [thread:$0]  (%p538_p5), %s268_s20, 128, %s270_s24, %s255_s26  }
 0x1e6 PF: > { %p374_p4 = scmp.ge.s32.totalorder %s477_s15, 2  ;;  %s281_s7 = sand.u32 1, %s465_s12  }
 0x1e7   : > { %s282_s8 = scalar_lea.sflag [#allocation3], %s281_s7 }
 0x1e8   : > { %p371_p7 = pnand %p374_p4, %p542_p6 }
 0x1ea   : > { %p372_p8 = pneg %p371_p7 }
 0x1ec   : > { %460 = dma.done.wait (%p372_p8), %s282_s8, 128  }
 0x1ed   : > { %462 = vsyncadd (%p372_p8), %s282_s8, 4294967168  ;;  %p13_p9 = scmp.ge.s32.totalorder %s525_s18, 4   ;;  %s600_s12 = smov %s469_s13 }
 0x1ee   : > { %s601_s13 = smov %s473_s14  ;;  %s602_s14 = smov %s536_s21 }
 0x1ef   : > { %s603_s15 = smov %s525_s18  ;;  %15 = sbr.rel (!%p13_p9) target bundleno = 3 (0x3), region = 73 }
 0x1f4   :  { %288 = vsyncpa [#allocation3], 1 }
 0x1f5   :  { %290 = vsyncpa [#allocation3 + $0x1], 1 }

</bundles_post_ra>
